<compile_context>
chip_gen: v5e
topology: v5e:2x2
jax: 0.10.0
libtpu: 0.0.40
codegen_flags: <defaults>
</compile_context>

<pallas_src>
import jax
import jax.numpy as jnp
from jax.experimental import pallas as pl
from jax.experimental.pallas import tpu as pltpu

LANES = 128          # vreg lane width (last dim of the slab)
MAX_TILE_ROWS = 1024 # (1024, 128) f32 block = 512 KiB


def _add_kernel(template_ref, displace_ref, out_ref):
    # Elementwise add of one (TILE_R, 128) tile.
    out_ref[...] = template_ref[...] + displace_ref[...]


def _round_up(x: int, m: int) -> int:
    return ((x + m - 1) // m) * m


def model_warmup_forward(template_params_flat: jax.Array,
                         displace_flat: jax.Array) -> jax.Array:
    """Computes (template_params + displace) reshaped to (N, 3)."""
    assert template_params_flat.shape == displace_flat.shape
    assert template_params_flat.ndim == 1
    L = template_params_flat.shape[0]
    assert L % 3 == 0, "flat parameter length must be a multiple of 3"
    dtype = template_params_flat.dtype

    # --- lane-dense 2-D layout: (rows, 128), rows padded to a multiple of tile_r ---
    rows = pl.cdiv(L, LANES)
    # Row tile: multiple of 8 (sublane), capped at MAX_TILE_ROWS; small inputs
    # collapse to a single grid step, which is optimal at that scale.
    tile_r = min(MAX_TILE_ROWS, _round_up(max(rows, 1), 8))
    rows_padded = _round_up(rows, tile_r)
    L_padded = rows_padded * LANES
    pad = L_padded - L

    if pad > 0:
        t_flat = jnp.pad(template_params_flat, (0, pad))
        d_flat = jnp.pad(displace_flat, (0, pad))
    else:
        t_flat = template_params_flat
        d_flat = displace_flat

    t2 = t_flat.reshape(rows_padded, LANES)
    d2 = d_flat.reshape(rows_padded, LANES)

    grid = (rows_padded // tile_r,)
    block = (tile_r, LANES)
    idx_map = lambda i: (i, 0)

    vertices_2d = pl.pallas_call(
        _add_kernel,
        out_shape=jax.ShapeDtypeStruct((rows_padded, LANES), dtype),
        grid=grid,
        in_specs=[
            pl.BlockSpec(block, idx_map),
            pl.BlockSpec(block, idx_map),
        ],
        out_specs=pl.BlockSpec(block, idx_map),
        compiler_params=pltpu.CompilerParams(
            dimension_semantics=("parallel",),
        ),
    )(t2, d2)

    # Glue (outside the kernel): drop pad tail, rearrange '(N C) -> N C', C=3.
    vertices_flat = vertices_2d.reshape(-1)[:L]
    return vertices_flat.reshape(-1, 3)


if __name__ == "__main__":
    # Small, deterministic setup consistent with the module:
    #   template_params: point-cloud template with N vertices x 3 coords,
    #   flattened by __init__ via .reshape(-1); displace initialized to zeros.
    N = 256                      # number of vertices
    L = N * 3

    key = jax.random.PRNGKey(0)
    template_params = jax.random.normal(key, (N, 3), dtype=jnp.float32)
    template_params_flat = template_params.reshape(-1)        # registered buffer
    displace_flat = jnp.zeros_like(template_params_flat)      # nn.Parameter init

    out = model_warmup_forward(template_params_flat, displace_flat)
    out = jax.block_until_ready(out)

    # Reference check (pure JAX)
    ref = (template_params_flat + displace_flat).reshape(-1, 3)
    assert out.shape == (N, 3), out.shape
    assert jnp.allclose(out, ref, atol=0, rtol=0), "mismatch vs reference"

    print("KERNEL_OK")
</pallas_src>

<mosaic_0001>
module attributes {stable_mosaic.version = 11 : i64} {
  func.func @_add_kernel(%arg0: i32, %arg1: memref<8x128xf32, #tpu.memory_space<vmem>>, %arg2: memref<8x128xf32, #tpu.memory_space<vmem>>, %arg3: memref<8x128xf32, #tpu.memory_space<vmem>>) attributes {dimension_semantics = [#tpu.dimension_semantics<parallel>], iteration_bounds = array<i64: 1>, scalar_prefetch = 0 : i64, scratch_operands = 0 : i64, tpu.core_type = #tpu.core_type<tc>, window_params = [{transform_indices = @transform_0, window_bounds = array<i64: 8, 128>}, {transform_indices = @transform_1, window_bounds = array<i64: 8, 128>}, {transform_indices = @transform_2, window_bounds = array<i64: 8, 128>}]} {
    %c0 = arith.constant 0 : index
    %c0_0 = arith.constant 0 : index
    %0 = vector.load %arg1[%c0, %c0_0] : memref<8x128xf32, #tpu.memory_space<vmem>>, vector<8x128xf32>
    %c0_1 = arith.constant 0 : index
    %c0_2 = arith.constant 0 : index
    %1 = vector.load %arg2[%c0_1, %c0_2] : memref<8x128xf32, #tpu.memory_space<vmem>>, vector<8x128xf32>
    %2 = arith.addf %0, %1 : vector<8x128xf32>
    %c0_3 = arith.constant 0 : index
    %c0_4 = arith.constant 0 : index
    %3 = vector.load %arg3[%c0_3, %c0_4] : memref<8x128xf32, #tpu.memory_space<vmem>>, vector<8x128xf32>
    tpu.vector_store %arg3[%c0_3, %c0_4], %2 {strides = array<i32>} : memref<8x128xf32, #tpu.memory_space<vmem>>, vector<8x128xf32>,
    return
  }
  func.func @transform_0(%arg0: i32) -> (i32, i32) {
    %c0_i32 = arith.constant 0 : i32
    %c0_i32_0 = arith.constant 0 : i32
    return %arg0, %c0_i32 : i32, i32
  }
  func.func @transform_1(%arg0: i32) -> (i32, i32) {
    %c0_i32 = arith.constant 0 : i32
    %c0_i32_0 = arith.constant 0 : i32
    return %arg0, %c0_i32 : i32, i32
  }
  func.func @transform_2(%arg0: i32) -> (i32, i32) {
    %c0_i32 = arith.constant 0 : i32
    %c0_i32_0 = arith.constant 0 : i32
    return %arg0, %c0_i32 : i32, i32
  }
}

</mosaic_0001>

<bundles_post_ra>
// kernel: tpu_custom_call.1
= control target key start
LH: loop header
LB: loop body
LE: loop exit
PB: predicated region body
PF: predicated region fallthrough
CT: control target
= control target key end

     0   :  { %7 = vsyncpa [#allocation3], 0  ;;  %s170_s0 = inlined_call_operand.hbm [shape: f32[8,128], index: 0, kind: input, shape index: {}]   ;;  %s171_s1 = inlined_call_operand.hbm [shape: f32[8,128], index: 1, kind: input, shape index: {}]   ;;  %s172_s2 = inlined_call_operand.hbm [shape: f32[8,128], index: 2, kind: output, shape index: {}]  }
   0x1   :  { %8 = vsyncpa [#allocation6], 0 }
   0x2   :  { %9 = vsyncpa [#allocation4], 0  ;;  %s15_s11 = sshll.u32 %s170_s0, 4  ;;  %s143_s12 = smov [#allocation2]   ;;  %s16_s11 = int_to_ptr.hbm [resolvable:$true] %s15_s11 }
   0x3   :  { %s17_s13 = sshll.u32 %s143_s12, 4  ;;  %s26_s16 = sshll.u32 %s171_s1, 4  ;;  %s18_s13 = int_to_ptr.vmem [resolvable:$true] %s17_s13  ;;  %s27_s16 = int_to_ptr.hbm [resolvable:$true] %s26_s16 }
   0x4   :  { %20 = dma.hbm_to_vmem [thread:$0]  %s16_s11, 128, %s18_s13, [#allocation3]  }
   0x5   :  { %s144_s17 = smov [#allocation5]  }
   0x6   :  { %s28_s18 = sshll.u32 %s144_s17, 4  ;;  %s29_s18 = int_to_ptr.vmem [resolvable:$true] %s28_s18 }
   0x7   :  { %31 = dma.hbm_to_vmem [thread:$0]  %s27_s16, 128, %s29_s18, [#allocation6]  }
   0x8   :  { %137 = dma.done.wait [#allocation3], 128  }
   0x9   :  { %138 = vsyncadd [#allocation3], 4294967168 }
   0xa   :  { %139 = dma.done.wait [#allocation6], 128  }
   0xb   :  { %140 = vsyncadd [#allocation6], 4294967168  ;;  %s145_s19 = smov [#allocation7]   ;;  %s51_s22 = sshll.u32 %s172_s2, 4  ;;  %v40_v0 = vld [vmem:[#allocation2] sm:$0xff]  ;;  %v41_v1 = vld [vmem:[#allocation5] sm:$0xff]  ;;  %s52_s22 = int_to_ptr.hbm [resolvable:$true] %s51_s22 }
   0xc   :  { %s49_s0 = sshll.u32 %s145_s19, 4  ;;  %v42_v2 = vadd.f32 %v41_v1, %v40_v0  ;;  %s50_s0 = int_to_ptr.vmem [resolvable:$true] %s49_s0 }
   0xe   :  { %43 = vst [vmem:[#allocation7] sm:$0xff] %v42_v2 }
   0xf   :  { %54 = dma.vmem_to_hbm [thread:$0]  %s50_s0, 128, %s52_s22, [#allocation4]  }
  0x10   :  { %141 = dma.done.wait [#allocation4], 128  }
  0x11   :  { %142 = vsyncadd [#allocation4], 4294967168 }
  0x12   :  { %59 = vsyncpa [#allocation3], 1 }
  0x13   :  { %60 = vsyncpa [#allocation6], 1 }
  0x14   :  { %61 = vsyncpa [#allocation4], 1 }

</bundles_post_ra>
